<compile_context>
chip_gen: v6e
topology: v6e:2x2x1
jax: 0.10.0
libtpu: 0.0.40
codegen_flags: <defaults>
</compile_context>

<pallas_src>
import math

import jax
import jax.numpy as jnp
from jax.experimental import pallas as pl
from jax.experimental.pallas import tpu as pltpu

_INV_SQRT2 = 1.0 / math.sqrt(2.0)
_TM_MIN = 16  # bf16 sublane-packed row granularity


def _gelu_erf(h):
    # Exact-erf GELU (matches torch.nn.GELU default used by BertIntermediate).
    return 0.5 * h * (1.0 + jax.lax.erf(h * _INV_SQRT2))


# ----------------------------------------------------------------------------
# Kernels
# ----------------------------------------------------------------------------
def ffn_kernel_weight_stationary(x_ref, w1_ref, b1_ref, w2_ref, b2_ref, o_ref):
    """Full-I kernel: weights resident in VMEM, one shot per row tile."""
    h = jnp.dot(x_ref[...], w1_ref[...],
                preferred_element_type=jnp.float32) + b1_ref[...]
    h = _gelu_erf(h)
    y = jnp.dot(h.astype(jnp.bfloat16), w2_ref[...],
                preferred_element_type=jnp.float32) + b2_ref[...]
    o_ref[...] = y.astype(o_ref.dtype)


def ffn_kernel_chunked(x_ref, w1_ref, b1_ref, w2_ref, b2_ref, o_ref, acc_ref):
    """Intermediate-dim chunked kernel with resident f32 accumulator."""
    j = pl.program_id(1)

    @pl.when(j == 0)
    def _init():
        # Fold b2 into the accumulator init (saves a zero-store + add).
        acc_ref[...] = jnp.broadcast_to(b2_ref[...], acc_ref.shape)

    # ff1 chunk: (tm, H) @ (H, ti) -> (tm, ti); bias + exact erf GELU in f32.
    h = jnp.dot(x_ref[...], w1_ref[...],
                preferred_element_type=jnp.float32) + b1_ref[...]
    h = _gelu_erf(h)

    # ff2 partial: (tm, ti) @ (ti, H) accumulated into resident f32 scratch.
    acc_ref[...] += jnp.dot(h.astype(jnp.bfloat16), w2_ref[...],
                            preferred_element_type=jnp.float32)

    @pl.when(j == pl.num_programs(1) - 1)
    def _finalize():
        o_ref[...] = acc_ref[...].astype(o_ref.dtype)


# ----------------------------------------------------------------------------
# Wrapper
# ----------------------------------------------------------------------------
def _round_up(x, m):
    return (x + m - 1) // m * m


def _vmem_capacity_bytes():
    try:
        info = pltpu.get_tpu_info()
        for name in ("vmem_capacity_bytes", "vmem_size_bytes", "vmem_bytes"):
            v = getattr(info, name, None)
            if v:
                return int(v)
    except Exception:
        pass
    return 64 * 1024 * 1024  # conservative: v7x per-TensorCore VMEM


def _vmem_estimate(tm, ti, H, out_itemsize, with_acc):
    """Rough VMEM footprint: double-buffered blocks + acc + live intermediates."""
    x_blk = tm * H * 2            # bf16
    w1_blk = H * ti * 2           # bf16
    w2_blk = ti * H * 2           # bf16
    out_blk = tm * H * out_itemsize
    bias_blk = (ti + H) * 4 * 8   # sublane-padded f32 biases (tiny)
    dbl = 2 * (x_blk + w1_blk + w2_blk + out_blk + bias_blk)
    acc = tm * H * 4 if with_acc else 0
    inter = tm * ti * 6           # f32 GELU intermediate + bf16 recast
    return dbl + acc + inter


def bert_ffn(x, w1, b1, w2, b2, *, tm=768, allow_weight_stationary=True):
    """x: [B, S, H]; w1: [H, I]; b1: [.., I]; w2: [I, H]; b2: [.., H]."""
    B, S, H = x.shape
    I = w1.shape[1]
    M = B * S
    out_dtype = x.dtype
    out_isz = jnp.dtype(out_dtype).itemsize

    # ---- tile selection --------------------------------------------------
    vmem_cap = _vmem_capacity_bytes()
    budget = int(0.72 * vmem_cap)

    tm = max(_TM_MIN, min(tm, _round_up(M, _TM_MIN)))

    use_ws = (allow_weight_stationary
              and _vmem_estimate(tm, I, H, out_isz, with_acc=False) <= budget)

    if use_ws:
        ti = I
    else:
        cand = [c for c in (2048, 1536, 1024, 768, 512, 384, 256, 128)
                if I % c == 0] or [I]
        ti = None
        while True:
            fit = [c for c in cand
                   if _vmem_estimate(tm, c, H, out_isz, with_acc=True) <= budget]
            if fit:
                ti = fit[0]
                break
            if tm > _TM_MIN:
                tm = max(_TM_MIN, _round_up(tm // 2, _TM_MIN))
            else:
                ti = cand[-1]  # accept overshoot; vmem limit raised below
                break

    Mp = _round_up(M, tm)
    # For modest M, split a single row tile in two so both v7x TCs get work.
    if Mp // tm == 1 and Mp >= 2 * _TM_MIN:
        tm2 = _round_up((Mp + 1) // 2, _TM_MIN)
        if tm2 < tm:
            tm = tm2
            Mp = _round_up(M, tm)
    grid_i = Mp // tm

    vmem_limit = min(int(0.9 * vmem_cap),
                     max(budget,
                         _vmem_estimate(tm, ti, H, out_isz, with_acc=not use_ws)))

    # ---- operand prep ------------------------------------------------------
    # bf16 activations/weights (production should pre-store weights in bf16).
    xf = x.reshape(M, H).astype(jnp.bfloat16)
    if Mp != M:
        xf = jnp.pad(xf, ((0, Mp - M), (0, 0)))
    w1b = w1 if w1.dtype == jnp.bfloat16 else w1.astype(jnp.bfloat16)
    w2b = w2 if w2.dtype == jnp.bfloat16 else w2.astype(jnp.bfloat16)
    b1f = b1.reshape(1, I).astype(jnp.float32)
    b2f = b2.reshape(1, H).astype(jnp.float32)

    # ---- cost estimate (counts weight re-streaming for this tiling) --------
    weight_passes = 1 if use_ws else grid_i
    cost = pl.CostEstimate(
        flops=4 * Mp * H * I,
        transcendentals=Mp * I,
        bytes_accessed=(Mp * H * 2                       # x (bf16) in
                        + Mp * H * out_isz               # y out
                        + weight_passes * 2 * H * I * 2  # W1 + W2 streams
                        + (I + H) * 4))                  # biases

    if use_ws:
        out = pl.pallas_call(
            ffn_kernel_weight_stationary,
            out_shape=jax.ShapeDtypeStruct((Mp, H), out_dtype),
            grid=(grid_i,),
            in_specs=[
                pl.BlockSpec((tm, H), lambda i: (i, 0)),   # x row tile
                pl.BlockSpec((H, I), lambda i: (0, 0)),    # W1 (resident)
                pl.BlockSpec((1, I), lambda i: (0, 0)),    # b1
                pl.BlockSpec((I, H), lambda i: (0, 0)),    # W2 (resident)
                pl.BlockSpec((1, H), lambda i: (0, 0)),    # b2
            ],
            out_specs=pl.BlockSpec((tm, H), lambda i: (i, 0)),
            compiler_params=pltpu.CompilerParams(
                dimension_semantics=("parallel",),
                vmem_limit_bytes=vmem_limit),
            cost_estimate=cost,
        )(xf, w1b, b1f, w2b, b2f)
    else:
        grid_j = I // ti
        out = pl.pallas_call(
            ffn_kernel_chunked,
            out_shape=jax.ShapeDtypeStruct((Mp, H), out_dtype),
            grid=(grid_i, grid_j),
            in_specs=[
                pl.BlockSpec((tm, H), lambda i, j: (i, 0)),   # x tile (revisited)
                pl.BlockSpec((H, ti), lambda i, j: (0, j)),   # W1 column chunk
                pl.BlockSpec((1, ti), lambda i, j: (0, j)),   # b1 chunk
                pl.BlockSpec((ti, H), lambda i, j: (j, 0)),   # W2 row chunk
                pl.BlockSpec((1, H), lambda i, j: (0, 0)),    # b2
            ],
            out_specs=pl.BlockSpec((tm, H), lambda i, j: (i, 0)),
            scratch_shapes=[pltpu.VMEM((tm, H), jnp.float32)],
            compiler_params=pltpu.CompilerParams(
                dimension_semantics=("parallel", "arbitrary"),
                vmem_limit_bytes=vmem_limit),
            cost_estimate=cost,
        )(xf, w1b, b1f, w2b, b2f)

    return out[:M].reshape(B, S, H)


# ----------------------------------------------------------------------------
# Reference (same bf16-matmul / f32-accumulate numerics as the kernel)
# ----------------------------------------------------------------------------
def _reference(x, w1, b1, w2, b2):
    B, S, H = x.shape
    xf = x.reshape(-1, H).astype(jnp.bfloat16)
    h = jnp.dot(xf, w1.astype(jnp.bfloat16),
                preferred_element_type=jnp.float32) + b1.reshape(1, -1)
    h = 0.5 * h * (1.0 + jax.lax.erf(h * _INV_SQRT2))
    y = jnp.dot(h.astype(jnp.bfloat16), w2.astype(jnp.bfloat16),
                preferred_element_type=jnp.float32) + b2.reshape(1, -1)
    return y.reshape(B, S, H).astype(x.dtype)


if __name__ == "__main__":
    # Small, BERT-shaped config: batch=2, seq=8, hidden=128, intermediate=512.
    B, S, H, I = 2, 8, 128, 512
    key = jax.random.PRNGKey(0)
    kx, k1, k2, k3, k4 = jax.random.split(key, 5)

    x = jax.random.normal(kx, (B, S, H), dtype=jnp.float32)
    # PyTorch Linear weights, pre-transposed to [in, out].
    w1 = jax.random.normal(k1, (H, I), dtype=jnp.float32) * 0.02
    b1 = jax.random.normal(k2, (1, I), dtype=jnp.float32) * 0.02
    w2 = jax.random.normal(k3, (I, H), dtype=jnp.float32) * 0.02
    b2 = jax.random.normal(k4, (1, H), dtype=jnp.float32) * 0.02

    y_ref = _reference(x, w1, b1, w2, b2)

    # Weight-stationary path (the one real BERT layers take).
    y_ws = bert_ffn(x, w1, b1, w2, b2)
    jax.block_until_ready(y_ws)
    assert y_ws.shape == (B, S, H)
    assert jnp.allclose(y_ws, y_ref, atol=2e-2, rtol=2e-2), "ws mismatch vs reference"

    # Chunked-accumulator fallback path (exercised explicitly for coverage).
    y_ck = bert_ffn(x, w1, b1, w2, b2, allow_weight_stationary=False)
    jax.block_until_ready(y_ck)
    assert y_ck.shape == (B, S, H)
    assert jnp.allclose(y_ck, y_ref, atol=2e-2, rtol=2e-2), "chunked mismatch vs reference"

    print("KERNEL_OK")
</pallas_src>

<mosaic_0001>
module attributes {stable_mosaic.version = 11 : i64} {
  func.func @ffn_kernel_weight_stationary(%arg0: i32, %arg1: memref<16x128xbf16, #tpu.memory_space<vmem>>, %arg2: memref<128x512xbf16, #tpu.memory_space<vmem>>, %arg3: memref<1x512xf32, #tpu.memory_space<vmem>>, %arg4: memref<512x128xbf16, #tpu.memory_space<vmem>>, %arg5: memref<1x128xf32, #tpu.memory_space<vmem>>, %arg6: memref<16x128xf32, #tpu.memory_space<vmem>>) attributes {dimension_semantics = [#tpu.dimension_semantics<parallel>], iteration_bounds = array<i64: 1>, scalar_prefetch = 0 : i64, scratch_operands = 0 : i64, tpu.core_type = #tpu.core_type<tc>, window_params = [{transform_indices = @transform_0, window_bounds = array<i64: 16, 128>}, {pipeline_mode = #tpu.pipeline_mode<synchronous>, transform_indices = @transform_1, window_bounds = array<i64: 128, 512>}, {pipeline_mode = #tpu.pipeline_mode<synchronous>, transform_indices = @transform_2, window_bounds = array<i64: 1, 512>}, {pipeline_mode = #tpu.pipeline_mode<synchronous>, transform_indices = @transform_3, window_bounds = array<i64: 512, 128>}, {pipeline_mode = #tpu.pipeline_mode<synchronous>, transform_indices = @transform_4, window_bounds = array<i64: 1, 128>}, {transform_indices = @transform_5, window_bounds = array<i64: 16, 128>}]} {
    %c0 = arith.constant 0 : index
    %c0_0 = arith.constant 0 : index
    %0 = vector.load %arg1[%c0, %c0_0] : memref<16x128xbf16, #tpu.memory_space<vmem>>, vector<16x128xbf16>
    %c0_1 = arith.constant 0 : index
    %c0_2 = arith.constant 0 : index
    %1 = vector.load %arg2[%c0_1, %c0_2] : memref<128x512xbf16, #tpu.memory_space<vmem>>, vector<128x512xbf16>
    %cst = arith.constant dense<0.000000e+00> : vector<16x512xf32>
    %2 = tpu.matmul %0, %1, %cst {dimension_numbers = #tpu.dot_dimension_numbers<[1], [0], [0], [1], [0, 0, 1, 1], [], []>} : vector<16x128xbf16>, vector<128x512xbf16>, vector<16x512xf32> -> vector<16x512xf32>
    %c0_3 = arith.constant 0 : index
    %c0_4 = arith.constant 0 : index
    %3 = vector.load %arg3[%c0_3, %c0_4] : memref<1x512xf32, #tpu.memory_space<vmem>>, vector<1x512xf32>
    %4 = vector.broadcast %3 : vector<1x512xf32> to vector<16x512xf32>
    %5 = arith.addf %2, %4 : vector<16x512xf32>
    %cst_5 = arith.constant 5.000000e-01 : f32
    %6 = vector.broadcast %cst_5 : f32 to vector<16x512xf32>
    %7 = arith.mulf %6, %5 : vector<16x512xf32>
    %cst_6 = arith.constant 0.707106769 : f32
    %8 = vector.broadcast %cst_6 : f32 to vector<16x512xf32>
    %9 = arith.mulf %5, %8 : vector<16x512xf32>
    %10 = math.erf %9 : vector<16x512xf32>
    %cst_7 = arith.constant 1.000000e+00 : f32
    %11 = vector.broadcast %cst_7 : f32 to vector<16x512xf32>
    %12 = arith.addf %11, %10 : vector<16x512xf32>
    %13 = arith.mulf %7, %12 : vector<16x512xf32>
    %14 = arith.truncf %13 : vector<16x512xf32> to vector<16x512xbf16>
    %c0_8 = arith.constant 0 : index
    %c0_9 = arith.constant 0 : index
    %15 = vector.load %arg4[%c0_8, %c0_9] : memref<512x128xbf16, #tpu.memory_space<vmem>>, vector<512x128xbf16>
    %cst_10 = arith.constant dense<0.000000e+00> : vector<16x128xf32>
    %16 = tpu.matmul %14, %15, %cst_10 {dimension_numbers = #tpu.dot_dimension_numbers<[1], [0], [0], [1], [0, 0, 1, 1], [], []>} : vector<16x512xbf16>, vector<512x128xbf16>, vector<16x128xf32> -> vector<16x128xf32>
    %c0_11 = arith.constant 0 : index
    %c0_12 = arith.constant 0 : index
    %17 = vector.load %arg5[%c0_11, %c0_12] : memref<1x128xf32, #tpu.memory_space<vmem>>, vector<1x128xf32>
    %18 = vector.broadcast %17 : vector<1x128xf32> to vector<16x128xf32>
    %19 = arith.addf %16, %18 : vector<16x128xf32>
    %c0_13 = arith.constant 0 : index
    %c0_14 = arith.constant 0 : index
    %20 = vector.load %arg6[%c0_13, %c0_14] : memref<16x128xf32, #tpu.memory_space<vmem>>, vector<16x128xf32>
    tpu.vector_store %arg6[%c0_13, %c0_14], %19 {strides = array<i32>} : memref<16x128xf32, #tpu.memory_space<vmem>>, vector<16x128xf32>,
    return
  }
  func.func @transform_0(%arg0: i32) -> (i32, i32) {
    %c0_i32 = arith.constant 0 : i32
    %c0_i32_0 = arith.constant 0 : i32
    return %arg0, %c0_i32 : i32, i32
  }
  func.func @transform_1(%arg0: i32) -> (i32, i32) {
    %c0_i32 = arith.constant 0 : i32
    %c0_i32_0 = arith.constant 0 : i32
    %c0_i32_1 = arith.constant 0 : i32
    return %c0_i32, %c0_i32_0 : i32, i32
  }
  func.func @transform_2(%arg0: i32) -> (i32, i32) {
    %c0_i32 = arith.constant 0 : i32
    %c0_i32_0 = arith.constant 0 : i32
    %c0_i32_1 = arith.constant 0 : i32
    return %c0_i32, %c0_i32_0 : i32, i32
  }
  func.func @transform_3(%arg0: i32) -> (i32, i32) {
    %c0_i32 = arith.constant 0 : i32
    %c0_i32_0 = arith.constant 0 : i32
    %c0_i32_1 = arith.constant 0 : i32
    return %c0_i32, %c0_i32_0 : i32, i32
  }
  func.func @transform_4(%arg0: i32) -> (i32, i32) {
    %c0_i32 = arith.constant 0 : i32
    %c0_i32_0 = arith.constant 0 : i32
    %c0_i32_1 = arith.constant 0 : i32
    return %c0_i32, %c0_i32_0 : i32, i32
  }
  func.func @transform_5(%arg0: i32) -> (i32, i32) {
    %c0_i32 = arith.constant 0 : i32
    %c0_i32_0 = arith.constant 0 : i32
    return %arg0, %c0_i32 : i32, i32
  }
}

</mosaic_0001>

<bundles_post_ra>
// kernel: tpu_custom_call.1
= control target key start
LH: loop header
LB: loop body
LE: loop exit
PB: predicated region body
PF: predicated region fallthrough
CT: control target
= control target key end

     0   :  { %10 = vsyncpa [#allocation3], 0  ;;  %s1180_s0 = inlined_call_operand.hbm [shape: bf16[16,128], index: 0, kind: input, shape index: {}]   ;;  %s1181_s1 = inlined_call_operand.hbm [shape: bf16[128,512], index: 1, kind: input, shape index: {}]   ;;  %s1182_s2 = inlined_call_operand.hbm [shape: f32[1,512], index: 2, kind: input, shape index: {}]   ;;  %s1183_s3 = inlined_call_operand.hbm [shape: bf16[512,128], index: 3, kind: input, shape index: {}]   ;;  %s1184_s4 = inlined_call_operand.vmem [shape: f32[1,128], index: 4, kind: input, shape index: {}]   ;;  %s1185_s5 = inlined_call_operand.hbm [shape: f32[16,128], index: 5, kind: output, shape index: {}]  }
   0x1   :  { %11 = vsyncpa [#allocation6], 0 }
   0x2   :  { %12 = vsyncpa [#allocation9], 0 }
   0x3   :  { %13 = vsyncpa [#allocation4], 0  ;;  %s1120_s18 = smov [#allocation5]  }
   0x4   :  { %s31_s19 = sshll.u32 %s1120_s18, 4  ;;  %s32_s19 = int_to_ptr.vmem [resolvable:$true] %s31_s19 }
   0x5   :  { %s1020_s20 = scalar_lea.vmem %s32_s19, 4096  ;;  %p1025_p1 = scmp.lt.s32.totalorder %s32_s19, %s32_s19 }
   0x6   :  { %p1021_p0 = scmp.ne.s32.totalorder %s32_s19, %s1020_s20  ;;  %p1026_p2 = scmp.lt.s32.totalorder %s1020_s20, %s1020_s20 }
   0x8   :  { %p1027_p3 = por %p1026_p2, %p1025_p1 }
   0xa   :  { %p1028_p4 = pnand %p1027_p3, %p1021_p0 }
   0xc   :  { %1031 = shalt.err (!%p1028_p4)
}
   0xd   :  { %s1121_s21 = smov 256   ;;  %s1122_s22 = smov 16  }
   0xe   :  { %37 = dma.hbm_to_vmem [thread:$0]  %s1181_s1, 4096, %s32_s19, [#allocation6], %s1121_s21, %s1121_s21, %s1122_s22  }
   0xf   :  { %s1123_s25 = smov [#allocation2]  }
  0x10   :  { %s19_s26 = sshll.u32 %s1123_s25, 4  ;;  %s20_s26 = int_to_ptr.vmem [resolvable:$true] %s19_s26 }
  0x11   :  { %s1040_s27 = scalar_lea.vmem %s20_s26, 128  ;;  %p1045_p6 = scmp.lt.s32.totalorder %s20_s26, %s20_s26 }
  0x12   :  { %p1041_p5 = scmp.ne.s32.totalorder %s20_s26, %s1040_s27  ;;  %p1046_p7 = scmp.lt.s32.totalorder %s1040_s27, %s1040_s27 }
  0x14   :  { %p1047_p8 = por %p1046_p7, %p1045_p6 }
  0x16   :  { %p1048_p9 = pnand %p1047_p8, %p1041_p5 }
  0x18   :  { %1051 = shalt.err (!%p1048_p9)
}
  0x19   :  { %s1124_s28 = smov 64   ;;  %s1125_s29 = smov 4  }
  0x1a   :  { %25 = dma.hbm_to_vmem [thread:$0]  %s1180_s0, 128, %s20_s26, [#allocation3], %s1124_s28, %s1124_s28, %s1125_s29  }
  0x1b   :  { %s1126_s7 = smov [#allocation7]   ;;  %s1127_s9 = smov [#allocation8]  }
  0x1c   :  { %s44_s8 = sshll.u32 %s1126_s7, 4  ;;  %s53_s1 = sshll.u32 %s1127_s9, 4  ;;  %s45_s8 = int_to_ptr.vmem [resolvable:$true] %s44_s8  ;;  %s54_s1 = int_to_ptr.vmem [resolvable:$true] %s53_s1 }
  0x1d   :  { %s1060_s10 = scalar_lea.vmem %s45_s8, 64  ;;  %p1065_p11 = scmp.lt.s32.totalorder %s45_s8, %s45_s8 }
  0x1e   :  { %p1061_p10 = scmp.ne.s32.totalorder %s45_s8, %s1060_s10  ;;  %p1066_p12 = scmp.lt.s32.totalorder %s1060_s10, %s1060_s10 }
  0x20   :  { %p1067_p13 = por %p1066_p12, %p1065_p11 }
  0x22   :  { %p1068_p0 = pnand %p1067_p13, %p1061_p10 }
  0x24   :  { %1071 = shalt.err (!%p1068_p0)
}
  0x25   :  { %47 = dma.hbm_to_vmem [thread:$0]  %s1182_s2, 64, %s45_s8, [#allocation6]  }
  0x26   :  { %s1080_s13 = scalar_lea.vmem %s54_s1, 4096  ;;  %p1085_p2 = scmp.lt.s32.totalorder %s54_s1, %s54_s1 }
  0x27   :  { %p1081_p1 = scmp.ne.s32.totalorder %s54_s1, %s1080_s13  ;;  %p1086_p3 = scmp.lt.s32.totalorder %s1080_s13, %s1080_s13 }
  0x29   :  { %p1087_p4 = por %p1086_p3, %p1085_p2 }
  0x2b   :  { %p1088_p5 = pnand %p1087_p4, %p1081_p1 }
  0x2d   :  { %1091 = shalt.err (!%p1088_p5)
}
  0x2e   :  { %59 = dma.hbm_to_vmem [thread:$0]  %s1183_s3, 4096, %s54_s1, [#allocation9], %s1124_s28, %s1124_s28, %s1125_s29  }
  0x2f   :  { %1112 = dma.done.wait [#allocation3], 128  }
  0x30   :  { %1113 = vsyncadd [#allocation3], 4294967168 }
  0x31   :  { %1114 = dma.done.wait [#allocation6], 4160  }
  0x32   :  { %1115 = vsyncadd [#allocation6], 4294963136 }
  0x33   :  { %1116 = dma.done.wait [#allocation9], 4096  }
  0x34   :  { %1117 = vsyncadd [#allocation9], 4294963200  ;;  %v1128_v0 = vmov 0   ;;  %v915_v1 = vld [vmem:[#allocation5 + $0xe4] ss:$16 sps:$4 sm:$0xff]   ;;  %v963_v33 = vld [vmem:[#allocation2] sm:$0xff]  }
  0x35   :  { %329 = vmatprep.mubr.bf16.mxu0 %v1128_v0  ;;  %372 = vmatprep.mubr.bf16.mxu1 %v1128_v0  ;;  %v917_v2 = vld [vmem:[#allocation5 + $0xec] ss:$16 sps:$4 sm:$0xff]   ;;  %v919_v3 = vld [vmem:[#allocation5 + $0xe0] ss:$16 sps:$4 sm:$0xff]   ;;  %v920_v4 = vld [vmem:[#allocation5 + $0xe8] ss:$16 sps:$4 sm:$0xff]  }
  0x36   :  { %297 = vmatprep.subr.bf16.mxu0 %v915_v1  ;;  %340 = vmatprep.subr.bf16.mxu1 %v917_v2  ;;  %v921_v5 = vld [vmem:[#allocation5 + $0xc4] ss:$16 sps:$4 sm:$0xff]   ;;  %v923_v6 = vld [vmem:[#allocation5 + $0xcc] ss:$16 sps:$4 sm:$0xff]   ;;  %v925_v7 = vld [vmem:[#allocation5 + $0xc0] ss:$16 sps:$4 sm:$0xff]   ;;  %v111_v2 = vlaneseq }
  0x37   :  { %298 = vmatpush1.bf16.msra.mxu0 %v919_v3  ;;  %341 = vmatpush1.bf16.msra.mxu1 %v920_v4  ;;  %v926_v8 = vld [vmem:[#allocation5 + $0xc8] ss:$16 sps:$4 sm:$0xff]   ;;  %v927_v9 = vld [vmem:[#allocation5 + $0xa4] ss:$16 sps:$4 sm:$0xff]   ;;  %v929_v10 = vld [vmem:[#allocation5 + $0xac] ss:$16 sps:$4 sm:$0xff]  }
  0x38   :  { %299 = vmatprep.subr.bf16.mxu0 %v921_v5  ;;  %342 = vmatprep.subr.bf16.mxu1 %v923_v6  ;;  %v931_v11 = vld [vmem:[#allocation5 + $0xa0] ss:$16 sps:$4 sm:$0xff]   ;;  %v932_v12 = vld [vmem:[#allocation5 + $0xa8] ss:$16 sps:$4 sm:$0xff]   ;;  %v933_v13 = vld [vmem:[#allocation5 + $0x84] ss:$16 sps:$4 sm:$0xff]  }
  0x39   :  { %v935_v14 = vld [vmem:[#allocation5 + $0x8c] ss:$16 sps:$4 sm:$0xff]   ;;  %v937_v15 = vld [vmem:[#allocation5 + $0x80] ss:$16 sps:$4 sm:$0xff]   ;;  %v938_v16 = vld [vmem:[#allocation5 + $0x88] ss:$16 sps:$4 sm:$0xff]  }
  0x3a   :  { %v939_v17 = vld [vmem:[#allocation5 + $0x64] ss:$16 sps:$4 sm:$0xff]   ;;  %v941_v18 = vld [vmem:[#allocation5 + $0x6c] ss:$16 sps:$4 sm:$0xff]   ;;  %v943_v19 = vld [vmem:[#allocation5 + $0x60] ss:$16 sps:$4 sm:$0xff]  }
  0x3b   :  { %300 = vmatpush1.bf16.msra.mxu0 %v925_v7  ;;  %343 = vmatpush1.bf16.msra.mxu1 %v926_v8  ;;  %v944_v20 = vld [vmem:[#allocation5 + $0x68] ss:$16 sps:$4 sm:$0xff]   ;;  %v945_v21 = vld [vmem:[#allocation5 + $0x44] ss:$16 sps:$4 sm:$0xff]   ;;  %v947_v22 = vld [vmem:[#allocation5 + $0x4c] ss:$16 sps:$4 sm:$0xff]  }
  0x3c   :  { %301 = vmatprep.subr.bf16.mxu0 %v927_v9  ;;  %344 = vmatprep.subr.bf16.mxu1 %v929_v10  ;;  %v949_v23 = vld [vmem:[#allocation5 + $0x40] ss:$16 sps:$4 sm:$0xff]   ;;  %v950_v24 = vld [vmem:[#allocation5 + $0x48] ss:$16 sps:$4 sm:$0xff]   ;;  %v951_v25 = vld [vmem:[#allocation5 + $0x24] ss:$16 sps:$4 sm:$0xff]  }
  0x3d   :  { %v953_v26 = vld [vmem:[#allocation5 + $0x2c] ss:$16 sps:$4 sm:$0xff]   ;;  %v955_v27 = vld [vmem:[#allocation5 + $0x20] ss:$16 sps:$4 sm:$0xff]   ;;  %v956_v28 = vld [vmem:[#allocation5 + $0x28] ss:$16 sps:$4 sm:$0xff]  }
  0x3e   :  { %v957_v29 = vld [vmem:[#allocation5 + $0x4] ss:$16 sps:$4 sm:$0xff]   ;;  %v959_v30 = vld [vmem:[#allocation5 + $0xc] ss:$16 sps:$4 sm:$0xff]   ;;  %v961_v31 = vld [vmem:[#allocation5] ss:$16 sps:$4 sm:$0xff]  }
  0x3f   :  { %302 = vmatpush1.bf16.msra.mxu0 %v931_v11  ;;  %345 = vmatpush1.bf16.msra.mxu1 %v932_v12  ;;  %v962_v32 = vld [vmem:[#allocation5 + $0x8] ss:$16 sps:$4 sm:$0xff]   ;;  %v964_v34 = vld [vmem:[#allocation8 + $0x78] sm:$0xff]   ;;  %v972_v42 = vld [vmem:[#allocation8 + $0x68] sm:$0xff]   ;;  %v112_v3 = vshrl.u32 %v111_v2, 7  ;;  %s1129_s15 = smov [#allocation10]  }
  0x40   :  { %303 = vmatprep.subr.bf16.mxu0 %v933_v13  ;;  %346 = vmatprep.subr.bf16.mxu1 %v935_v14  ;;  %v965_v35 = vld [vmem:[#allocation8 + $0xf8] sm:$0xff]   ;;  %v968_v38 = vld [vmem:[#allocation8 + $0x70] sm:$0xff]   ;;  %v973_v43 = vld [vmem:[#allocation8 + $0xe8] sm:$0xff]   ;;  %s779_s16 = sshll.u32 %s1129_s15, 4  ;;  %s780_s16 = int_to_ptr.vmem [resolvable:$true] %s779_s16 }
  0x41   :  { %v966_v36 = vld [vmem:[#allocation8 + $0x38] sm:$0xff]   ;;  %v969_v39 = vld [vmem:[#allocation8 + $0xf0] sm:$0xff]   ;;  %v974_v44 = vld [vmem:[#allocation8 + $0x28] sm:$0xff]   ;;  %v113_v4 = vsub.s32 0, %v112_v3  ;;  %v121_v5 = vsub.s32 2, %v112_v3  ;;  %v117_v7 = vsub.s32 1, %v112_v3  ;;  %p1097_p7 = scmp.lt.s32.totalorder %s780_s16, %s780_s16 }
  0x42   :  { %v967_v37 = vld [vmem:[#allocation8 + $0xb8] sm:$0xff]   ;;  %v970_v40 = vld [vmem:[#allocation8 + $0x30] sm:$0xff]   ;;  %v975_v45 = vld [vmem:[#allocation8 + $0xa8] sm:$0xff]   ;;  %v125_v8 = vsub.s32 3, %v112_v3 }
  0x43   :  { %304 = vmatpush1.bf16.msra.mxu0 %v937_v15  ;;  %347 = vmatpush1.bf16.msra.mxu1 %v938_v16  ;;  %v971_v41 = vld [vmem:[#allocation8 + $0xb0] sm:$0xff]   ;;  %v976_v46 = vld [vmem:[#allocation8 + $0x60] sm:$0xff]   ;;  %v980_v50 = vld [vmem:[#allocation8 + $0x58] sm:$0xff]  }
  0x44   :  { %305 = vmatprep.subr.bf16.mxu0 %v939_v17  ;;  %348 = vmatprep.subr.bf16.mxu1 %v941_v18  ;;  %v977_v47 = vld [vmem:[#allocation8 + $0xe0] sm:$0xff]   ;;  %v981_v51 = vld [vmem:[#allocation8 + $0xd8] sm:$0xff]   ;;  %v984_v54 = vld [vmem:[#allocation8 + $0x50] sm:$0xff]  }
  0x45   :  { %v978_v48 = vld [vmem:[#allocation8 + $0x20] sm:$0xff]   ;;  %v982_v52 = vld [vmem:[#allocation8 + $0x18] sm:$0xff]   ;;  %v985_v55 = vld [vmem:[#allocation8 + $0xd0] sm:$0xff]  }
  0x46   :  { %v979_v49 = vld [vmem:[#allocation8 + $0xa0] sm:$0xff]   ;;  %v983_v53 = vld [vmem:[#allocation8 + $0x98] sm:$0xff]   ;;  %v986_v56 = vld [vmem:[#allocation8 + $0x10] sm:$0xff]  }
  0x47   :  { %306 = vmatpush1.bf16.msra.mxu0 %v943_v19  ;;  %349 = vmatpush1.bf16.msra.mxu1 %v944_v20  ;;  %v987_v57 = vld [vmem:[#allocation8 + $0x90] sm:$0xff]   ;;  %v988_v58 = vld [vmem:[#allocation8 + $0x48] sm:$0xff]   ;;  %v992_v62 = vld [vmem:[#allocation8 + $0x40] sm:$0xff]  }
  0x48   :  { %307 = vmatprep.subr.bf16.mxu0 %v945_v21  ;;  %350 = vmatprep.subr.bf16.mxu1 %v947_v22  ;;  %v989_v59 = vld [vmem:[#allocation8 + $0xc8] sm:$0xff]   ;;  %v993_v63 = vld [vmem:[#allocation8 + $0xc0] sm:$0xff]   ;;  %v109_v6 = vld [vmem:[#allocation7] sm:$0xf] }
  0x49   :  { %v990_v60 = vld [vmem:[#allocation8 + $0x8] sm:$0xff]   ;;  %v994_v0 = vld [vmem:[#allocation8] sm:$0xff]   ;;  %v114_v9 = vrot.slane %v109_v6, %v113_v4  ;;  %v122_v10 = vrot.slane %v109_v6, %v121_v5  ;;  %v118_v13 = vrot.slane %v109_v6, %v117_v7  ;;  %v126_v14 = vrot.slane %v109_v6, %v125_v8 }
  0x4a   :  { %v991_v61 = vld [vmem:[#allocation8 + $0x88] sm:$0xff]   ;;  %v995_v1 = vld [vmem:[#allocation8 + $0x80] sm:$0xff]  }
  0x4b   :  { %308 = vmatpush1.bf16.msra.mxu0 %v949_v23  ;;  %351 = vmatpush1.bf16.msra.mxu1 %v950_v24 }
  0x4c   :  { %309 = vmatprep.subr.bf16.mxu0 %v951_v25  ;;  %352 = vmatprep.subr.bf16.mxu1 %v953_v26 }
  0x4f   :  { %310 = vmatpush1.bf16.msra.mxu0 %v955_v27  ;;  %353 = vmatpush1.bf16.msra.mxu1 %v956_v28 }
  0x50   :  { %311 = vmatprep.subr.bf16.mxu0 %v957_v29  ;;  %354 = vmatprep.subr.bf16.mxu1 %v959_v30 }
  0x53   :  { %312 = vmatpush1.bf16.msra.mxu0 %v961_v31  ;;  %355 = vmatpush1.bf16.msra.mxu1 %v962_v32 }
  0x54   :  { %859 = vmatprep.subr.bf16.mxu0 %v964_v34  ;;  %881 = vmatprep.subr.bf16.mxu1 %v965_v35 }
  0x56   :  { %330 = vmatmul.mubr.bf16.vlgmr.msra.gmra.mxu0 %v963_v33  ;;  %373 = vmatmul.mubr.bf16.vlgmr.msra.gmra.mxu1 %v963_v33 }
  0x57   :  { %860 = vmatpush3.bf16.msra.mxu0 %v966_v36  ;;  %882 = vmatpush3.bf16.msra.mxu1 %v967_v37 }
  0x58   :  { %861 = vmatprep.subr.bf16.mxu0 %v968_v38  ;;  %883 = vmatprep.subr.bf16.mxu1 %v969_v39 }
  0x5b   :  { %862 = vmatpush3.bf16.msra.mxu0 %v970_v40  ;;  %884 = vmatpush3.bf16.msra.mxu1 %v971_v41 }
  0x5c   :  { %863 = vmatprep.subr.bf16.mxu0 %v972_v42  ;;  %885 = vmatprep.subr.bf16.mxu1 %v973_v43 }
  0x5f   :  { %864 = vmatpush3.bf16.msra.mxu0 %v974_v44  ;;  %886 = vmatpush3.bf16.msra.mxu1 %v975_v45 }
  0x60   :  { %865 = vmatprep.subr.bf16.mxu0 %v976_v46  ;;  %887 = vmatprep.subr.bf16.mxu1 %v977_v47 }
  0x63   :  { %866 = vmatpush3.bf16.msra.mxu0 %v978_v48  ;;  %888 = vmatpush3.bf16.msra.mxu1 %v979_v49 }
  0x64   :  { %867 = vmatprep.subr.bf16.mxu0 %v980_v50  ;;  %889 = vmatprep.subr.bf16.mxu1 %v981_v51 }
  0x67   :  { %868 = vmatpush3.bf16.msra.mxu0 %v982_v52  ;;  %890 = vmatpush3.bf16.msra.mxu1 %v983_v53 }
  0x68   :  { %869 = vmatprep.subr.bf16.mxu0 %v984_v54  ;;  %891 = vmatprep.subr.bf16.mxu1 %v985_v55 }
  0x6b   :  { %870 = vmatpush3.bf16.msra.mxu0 %v986_v56  ;;  %892 = vmatpush3.bf16.msra.mxu1 %v987_v57 }
  0x6c   :  { %871 = vmatprep.subr.bf16.mxu0 %v988_v58  ;;  %893 = vmatprep.subr.bf16.mxu1 %v989_v59 }
  0x6f   :  { %872 = vmatpush3.bf16.msra.mxu0 %v990_v60  ;;  %894 = vmatpush3.bf16.msra.mxu1 %v991_v61 }
  0x70   :  { %873 = vmatprep.subr.bf16.mxu0 %v992_v62  ;;  %895 = vmatprep.subr.bf16.mxu1 %v993_v63 }
  0x73   :  { %874 = vmatpush3.bf16.msra.mxu0 %v994_v0  ;;  %896 = vmatpush3.bf16.msra.mxu1 %v995_v1 }
 0x116   :  { %v331_v11 = vpop.f32.mrf.mxu0  ;;  %v374_v12 = vpop.f32.mrf.mxu1 }
 0x117   :  { %v332_v15 = vadd.f32 %v331_v11, %v114_v9  ;;  %v375_v16 = vadd.f32 %v374_v12, %v122_v10  ;;  %v826_v11 = vld [vmem:[%s1184_s4] ss:$0 sm:$0xff]  ;;  %s1092_s4 = scalar_lea.vmem %s780_s16, 256 }
 0x118   :  { %v333_v17 = vpop.f32.mrf.mxu0  ;;  %v376_v18 = vpop.f32.mrf.mxu1  ;;  %p1093_p6 = scmp.ne.s32.totalorder %s780_s16, %s1092_s4  ;;  %p1098_p8 = scmp.lt.s32.totalorder %s1092_s4, %s1092_s4 }
 0x119   :  { %v391_v19 = vmul.f32 0.70710677, %v332_v15  ;;  %v393_v20 = vmul.f32 0.70710677, %v375_v16  ;;  %v334_v21 = vadd.f32 %v333_v17, %v118_v13  ;;  %v377_v22 = vadd.f32 %v376_v18, %v126_v14 }
 0x11a   :  { %v335_v23 = vpop.f32.mrf.mxu0  ;;  %v378_v24 = vpop.f32.mrf.mxu1  ;;  %v383_v43 = vmul.f32 0.5, %v332_v15  ;;  %v385_v61 = vmul.f32 0.5, %v375_v16  ;;  %p1099_p9 = por %p1098_p8, %p1097_p7 }
 0x11b   :  { %v336_v25 = vadd.f32 %v335_v23, %v114_v9  ;;  %v379_v26 = vadd.f32 %v378_v24, %v122_v10  ;;  %996 = verf.f32 %v391_v19  ;;  %v392_v27 = vmul.f32 0.70710677, %v334_v21 }
 0x11c   :  { %v337_v28 = vpop.f32.mrf.mxu0  ;;  %v380_v29 = vpop.f32.mrf.mxu1  ;;  %998 = verf.f32 %v393_v20  ;;  %v394_v30 = vmul.f32 0.70710677, %v377_v22  ;;  %v384_v44 = vmul.f32 0.5, %v334_v21  ;;  %v386_v57 = vmul.f32 0.5, %v377_v22  ;;  %p1100_p10 = pnand %p1099_p9, %p1093_p6 }
 0x11d   :  { %v395_v31 = vmul.f32 0.70710677, %v336_v25  ;;  %1000 = verf.f32 %v392_v27  ;;  %v397_v32 = vmul.f32 0.70710677, %v379_v26  ;;  %v338_v33 = vadd.f32 %v337_v28, %v118_v13 }
 0x11e   :  { %v381_v34 = vadd.f32 %v380_v29, %v126_v14  ;;  %1002 = verf.f32 %v394_v30  ;;  %v387_v50 = vmul.f32 0.5, %v336_v25  ;;  %v389_v54 = vmul.f32 0.5, %v379_v26 }
 0x11f   :  { %1004 = verf.f32 %v395_v31  ;;  %v396_v35 = vmul.f32 0.70710677, %v338_v33  ;;  %v388_v55 = vmul.f32 0.5, %v338_v33 }
 0x120   :  { %1006 = verf.f32 %v397_v32  ;;  %v398_v36 = vmul.f32 0.70710677, %v381_v34  ;;  %v390_v59 = vmul.f32 0.5, %v381_v34 }
 0x121   :  { %1008 = verf.f32 %v396_v35 }
 0x122   :  { %1010 = verf.f32 %v398_v36 }
 0x128   :  { %v997_v37 = vpop.eup %996 }
 0x129   :  { %v999_v38 = vpop.eup %998  ;;  %v407_v48 = vadd.f32 1.0, %v997_v37 }
 0x12a   :  { %v1001_v39 = vpop.eup %1000  ;;  %v409_v53 = vadd.f32 1.0, %v999_v38 }
 0x12b   :  { %v1003_v40 = vpop.eup %1002  ;;  %v408_v45 = vadd.f32 1.0, %v1001_v39  ;;  %v415_v1 = vmul.f32 %v407_v48, %v383_v43 }
 0x12c   :  { %v1005_v41 = vpop.eup %1004  ;;  %v410_v49 = vadd.f32 1.0, %v1003_v40  ;;  %v417_v4 = vmul.f32 %v409_v53, %v385_v61 }
 0x12d   :  { %v1007_v42 = vpop.eup %1006  ;;  %v411_v46 = vadd.f32 1.0, %v1005_v41  ;;  %v416_v62 = vmul.f32 %v408_v45, %v384_v44 }
 0x12e   :  { %v1009_v47 = vpop.eup %1008  ;;  %v413_v51 = vadd.f32 1.0, %v1007_v42  ;;  %v418_v2 = vmul.f32 %v410_v49, %v386_v57 }
 0x12f   :  { %v1011_v52 = vpop.eup %1010  ;;  %v412_v56 = vadd.f32 1.0, %v1009_v47  ;;  %v419_v58 = vmul.f32 %v411_v46, %v387_v50 }
 0x130   :  { %v414_v60 = vadd.f32 1.0, %v1011_v52  ;;  %v421_v63 = vmul.f32 %v413_v51, %v389_v54 }
 0x131   :  { %v420_v0 = vmul.f32 %v412_v56, %v388_v55  ;;  %v423_v6 = vpack.c.bf16 %v419_v58, %v415_v1 }
 0x132   :  { %v422_v3 = vmul.f32 %v414_v60, %v390_v59  ;;  %v425_v8 = vpack.c.bf16 %v421_v63, %v417_v4 }
 0x133   :  { %v424_v5 = vpack.c.bf16 %v420_v0, %v416_v62 }
 0x134   :  { %v426_v7 = vpack.c.bf16 %v422_v3, %v418_v2 }
 0x135   :  { %722 = vmatprep.mubr.bf16.mxu0 %v424_v5 }
 0x136   :  { %763 = vmatprep.mubr.bf16.mxu1 %v426_v7  ;;  %723 = vmatmul.mubr.bf16.vlgmr.msra.gmra.mxu0 %v423_v6 }
 0x137   :  { %764 = vmatmul.mubr.bf16.vlgmr.msra.gmra.mxu1 %v425_v8 }
 0x1f6   :  { %v875_v9 = vpop.f32.mrf.mxu0 }
 0x1f7   :  { %v897_v10 = vpop.f32.mrf.mxu1 }
 0x1f8   :  { %v876_v12 = vpop.f32.mrf.mxu0 }
 0x1f9   :  { %v877_v13 = vadd.f32 %v876_v12, %v875_v9  ;;  %v898_v14 = vpop.f32.mrf.mxu1 }
 0x1fa   :  { %v878_v15 = vpop.f32.mrf.mxu0  ;;  %v899_v17 = vadd.f32 %v898_v14, %v897_v10 }
 0x1fb   :  { %v725_v16 = vadd.f32 %v877_v13, %v826_v11  ;;  %v900_v18 = vpop.f32.mrf.mxu1 }
 0x1fc   :  { %v879_v19 = vpop.f32.mrf.mxu0 }
 0x1fd   :  { %v766_v20 = vadd.f32 %v899_v17, %v725_v16  ;;  %v880_v21 = vadd.f32 %v879_v19, %v878_v15  ;;  %v901_v22 = vpop.f32.mrf.mxu1 }
 0x1fe   :  { %v902_v24 = vadd.f32 %v901_v22, %v900_v18 }
 0x1ff   :  { %772 = vst [vmem:[#allocation10] sm:$0xff] %v766_v20  ;;  %v728_v23 = vadd.f32 %v880_v21, %v826_v11 }
 0x201   :  { %v769_v25 = vadd.f32 %v902_v24, %v728_v23 }
 0x203   :  { %773 = vst [vmem:[#allocation10 + $0x8] sm:$0xff] %v769_v25 }
 0x204   :  { %1103 = shalt.err (!%p1100_p10)
}
 0x205   :  { %s1130_s17 = smov 128   ;;  %s1131_s18 = smov 8  }
 0x206   :  { %785 = dma.vmem_to_hbm [thread:$0]  %s780_s16, 256, %s1185_s5, [#allocation4], %s1130_s17, %s1130_s17, %s1131_s18  }
 0x207   :  { %1118 = dma.done.wait [#allocation4], 256  }
 0x208   :  { %1119 = vsyncadd [#allocation4], 4294967040 }
 0x209   :  { %789 = vsyncpa [#allocation3], 1 }
 0x20a   :  { %790 = vsyncpa [#allocation6], 1 }
 0x20b   :  { %791 = vsyncpa [#allocation9], 1 }
 0x20c   :  { %792 = vsyncpa [#allocation4], 1 }

</bundles_post_ra>
